<compile_context>
chip_gen: v6e
topology: v6e:2x2x1
jax: 0.10.0
libtpu: 0.0.40
codegen_flags: <defaults>
</compile_context>

<pallas_src>
import functools

import jax
import jax.numpy as jnp
from jax import lax
from jax.experimental import pallas as pl
from jax.experimental.pallas import tpu as pltpu


def _round_up(x, m):
  return ((x + m - 1) // m) * m


def _chip_config():
  """Chip-keyed tile / VMEM defaults (v5e: 128 MXU tiles, v6e/v7x: 256)."""
  t_tile_max = 128
  vmem_limit = 48 * 1024 * 1024          # conservative: fits v7x's 64 MiB/TC
  try:
    kind = jax.devices()[0].device_kind.lower()
    if "v5" not in kind:
      t_tile_max = 256
  except Exception:
    pass
  try:
    cap = pltpu.get_tpu_info().vmem_capacity_bytes
    vmem_limit = min(int(cap * 3 // 4), 96 * 1024 * 1024)
  except Exception:
    pass
  return t_tile_max, vmem_limit


# ---------------------------------------------------------------------------
# Kernel A: hoisted patch-embedding projection (computed ONCE, not per T-tile)
# ---------------------------------------------------------------------------
def proj_kernel(w_ref, img_ref, feat_ref):
  """w_ref: [D, C] bf16, img_ref: [C, hw_tile] bf16 -> feat_ref: [D, hw_tile] bf16."""
  feat_ref[...] = lax.dot_general(
      w_ref[...], img_ref[...],
      dimension_numbers=(((1,), (0,)), ((), ())),      # natural [M,K]x[K,N]
      preferred_element_type=jnp.float32).astype(feat_ref.dtype)


def project_image(img_chw, w_imgT, *, vmem_limit):
  c, hw = img_chw.shape
  d = w_imgT.shape[0]
  hw_tile = min(hw, 2048)
  while hw % hw_tile:                     # hw is a multiple of 128, terminates
    hw_tile //= 2
  grid = (hw // hw_tile,)
  return pl.pallas_call(
      proj_kernel,
      grid=grid,
      out_shape=jax.ShapeDtypeStruct((d, hw), jnp.bfloat16),
      in_specs=[
          pl.BlockSpec((d, c), lambda i: (0, 0)),        # weights: constant block
          pl.BlockSpec((c, hw_tile), lambda i: (0, i)),  # image: per-HW tile
      ],
      out_specs=pl.BlockSpec((d, hw_tile), lambda i: (0, i)),
      compiler_params=pltpu.CompilerParams(
          dimension_semantics=("parallel",),
          vmem_limit_bytes=vmem_limit),
  )(w_imgT, img_chw)


# ---------------------------------------------------------------------------
# Kernel B: one CaR stage, one T-tile of text prompts per grid step
# ---------------------------------------------------------------------------
def car_stage_kernel(featdhw_ref, feathwd_ref, camtxt_ref, semT_ref,
                     semdiag_ref, mask_ref, score_ref, *,
                     clipes_threshold, mask_threshold, logit_scale):
  """Fused CAM -> binarize -> mask-pool -> similarity-softmax-diag -> mask.

  featdhw_ref : [D, HW]        bf16 image features (constant block)
  feathwd_ref : [HW, D]        bf16 image features, transposed layout (constant)
  camtxt_ref  : [Tt, D]        bf16 CAM text embeddings for this tile
  semT_ref    : [D, T]         bf16 pre-normalized semantic text (constant)
  semdiag_ref : [Tt, D]        f32  pre-normalized semantic text rows of tile
  mask_ref    : [Tt, HW]       bf16 output: mask_threshold-binarized CAM (0/1)
  score_ref   : [Tt, 128]      f32  output: per-mask softmax-diag confidence
  """
  eps = 1e-6

  # (2) CLIP-CAM proxy: [Tt, HW] = [Tt, D] @ [D, HW]   (natural orientation)
  cam = lax.dot_general(
      camtxt_ref[...], featdhw_ref[...],
      dimension_numbers=(((1,), (0,)), ((), ())),
      preferred_element_type=jnp.float32)                       # [Tt, HW] f32
  cam = jnp.maximum(cam, 0.0)
  # NOTE: after ReLU the per-row min is usually 0, so this effectively becomes
  # max-normalization; semantics kept identical to the reference CLIP-ES code.
  cam_min = jnp.min(cam, axis=-1, keepdims=True)                # [Tt, 1]
  cam_max = jnp.max(cam, axis=-1, keepdims=True)                # [Tt, 1]
  inv_rng = 1.0 / (cam_max - cam_min + eps)                     # exact, tiny
  cam = (cam - cam_min) * inv_rng                               # [0, 1]

  # (3) binarize at the CLIP-ES threshold.
  bin_cam = (cam > clipes_threshold).astype(jnp.float32)        # [Tt, HW]

  # (4) visual-prompted feature proxy: mask-average-pooled image features.
  # TODO(synk): the original draws a circle/box prompt on the PIL image and
  # re-encodes it with a second CLIP model; masked average pooling of the
  # image features is the in-kernel stand-in.
  mask_area = jnp.sum(bin_cam, axis=-1, keepdims=True) + eps    # [Tt, 1]
  pooled = lax.dot_general(                                     # [Tt,HW]x[HW,D]
      bin_cam.astype(jnp.bfloat16), feathwd_ref[...],
      dimension_numbers=(((1,), (0,)), ((), ())),               # natural
      preferred_element_type=jnp.float32)                       # [Tt, D] f32
  pooled = pooled * (1.0 / mask_area)                           # exact, tiny

  # (5) CLIP similarity: L2-normalize, scaled logits, softmax diagonal.
  pooled = pooled * lax.rsqrt(
      jnp.sum(pooled * pooled, axis=-1, keepdims=True) + eps)
  logits = logit_scale * lax.dot_general(                       # [Tt,D]x[D,T]
      pooled.astype(jnp.bfloat16), semT_ref[...],
      dimension_numbers=(((1,), (0,)), ((), ())),               # natural
      preferred_element_type=jnp.float32)                       # [Tt, T]
  rowmax = jnp.max(logits, axis=-1, keepdims=True)              # [Tt, 1]
  rowsum = jnp.sum(jnp.exp(logits - rowmax), axis=-1, keepdims=True)

  # Diagonal as a per-row dot against this tile's own semantic rows
  # (assumes cam_text_feat and sem_text_feat share row ordering, as in CaR).
  diag_logit = logit_scale * jnp.sum(
      pooled * semdiag_ref[...], axis=-1, keepdims=True)        # [Tt, 1]
  score = jnp.exp(diag_logit - rowmax) / rowsum                 # exact divide

  score_ref[...] = jnp.broadcast_to(score, score_ref.shape)     # lane-dense
  # (6) fused final binarization (PostProcess/CRF stand-in), bf16 writeback.
  mask_ref[...] = (cam > mask_threshold).astype(mask_ref.dtype)


def car_forward(image, w_img, cam_text_feat, sem_text_feat,
                *, clipes_threshold=0.4, confidence_threshold=0.45,
                mask_threshold=0.5, logit_scale=100.0, t_tile=None):
  """CaR.forward equivalent: (pseudo_masks [T, H, W], conf_scores [T]).

  logit_scale defaults to 100.0 (CLIP's learned scale ~ exp(4.6)); pass the
  real model scale for threshold-faithful confidences.
  """
  c, h, w = image.shape
  hw = h * w
  t, d = cam_text_feat.shape
  assert hw % 128 == 0, f"H*W must be a multiple of 128 (lane-dense), got {hw}"

  t_tile_max, vmem_limit = _chip_config()
  if t_tile is None:
    t_tile = min(_round_up(t, 8), t_tile_max)
  t_pad = _round_up(t, t_tile)
  grid = (t_pad // t_tile,)

  # ---- one-time host/XLA prep (all loop-invariant work hoisted) ------------
  img_chw = image.reshape(c, hw).astype(jnp.bfloat16)           # [C, HW]
  w_imgT = w_img.T.astype(jnp.bfloat16)                         # [D, C]

  # Hoisted projection: computed once instead of once per T-tile.
  img_feat_dhw = project_image(img_chw, w_imgT, vmem_limit=vmem_limit)  # [D,HW]
  # Second natural-orientation copy for the HW-contraction; one-time transpose.
  img_feat_hwd = img_feat_dhw.T                                         # [HW,D]

  # Pre-normalize semantic text once; pass transposed bf16 for the logits GEMM
  # and per-tile f32 rows for the diagonal dot.
  sem_norm = sem_text_feat.astype(jnp.float32)
  sem_norm = sem_norm / jnp.sqrt(
      jnp.sum(sem_norm * sem_norm, axis=-1, keepdims=True) + 1e-6)
  sem_full_T = sem_norm.T.astype(jnp.bfloat16)                  # [D, T]
  sem_diag = jnp.zeros((t_pad, d), jnp.float32).at[:t].set(sem_norm)

  cam_txt = jnp.zeros((t_pad, d), jnp.bfloat16).at[:t].set(
      cam_text_feat.astype(jnp.bfloat16))

  kernel = functools.partial(
      car_stage_kernel,
      clipes_threshold=float(clipes_threshold),
      mask_threshold=float(mask_threshold),
      logit_scale=float(logit_scale))

  # TODO(synk): for very large HW on v7x (64 MiB VMEM) a second grid axis over
  # HW with a two-pass min/max + pooled-sum scheme would be needed; the single
  # resident HW block is kept here for clarity.
  masks, scores = pl.pallas_call(
      kernel,
      grid=grid,
      out_shape=(jax.ShapeDtypeStruct((t_pad, hw), jnp.bfloat16),
                 jax.ShapeDtypeStruct((t_pad, 128), jnp.float32)),
      in_specs=[
          pl.BlockSpec((d, hw), lambda i: (0, 0)),       # img_feat [D,HW], constant
          pl.BlockSpec((hw, d), lambda i: (0, 0)),       # img_feat [HW,D], constant
          pl.BlockSpec((t_tile, d), lambda i: (i, 0)),   # CAM text: per tile
          pl.BlockSpec((d, t), lambda i: (0, 0)),        # sem text^T: constant
          pl.BlockSpec((t_tile, d), lambda i: (i, 0)),   # sem text diag rows
      ],
      out_specs=(
          pl.BlockSpec((t_tile, hw), lambda i: (i, 0)),
          pl.BlockSpec((t_tile, 128), lambda i: (i, 0)),
      ),
      compiler_params=pltpu.CompilerParams(
          dimension_semantics=("parallel",),
          vmem_limit_bytes=vmem_limit),
  )(img_feat_dhw, img_feat_hwd, cam_txt, sem_full_T, sem_diag)

  scores = scores[:t, 0]                                         # [T]
  masks = masks[:t]                                              # [T, HW]

  # _forward_stage / _filter_texts semantics: keep masks whose score passes
  # the confidence threshold; if none pass, fall back to the argmax mask.
  passing = scores > confidence_threshold
  any_pass = jnp.any(passing)
  argmax_keep = jnp.arange(t) == jnp.argmax(scores)
  keep = jnp.where(any_pass, passing, argmax_keep)
  all_scores = jnp.where(keep, scores, 0.0)

  # TODO(synk): the data-dependent while-loop (CLIP-as-RNN recurrence over
  # shrinking text sets) has no clean static-shape Pallas equivalent; a single
  # stage is executed here.
  # TODO(synk): PostProcess applies a dense-CRF refinement with no Pallas
  # equivalent; the in-kernel mask_threshold binarization stands in.
  refined = masks.astype(jnp.float32).reshape(t, h, w)
  final_masks = jnp.where(keep[:, None, None], refined, 0.0)
  return final_masks, all_scores


if __name__ == "__main__":
  key = jax.random.PRNGKey(0)
  k_img, k_w, k_cam, k_sem = jax.random.split(key, 4)

  C, H, W = 4, 16, 16     # image: NCHW with N=1 squeezed -> [C, H, W]
  T, D = 4, 32            # num text prompts, embedding dim

  image = jax.random.normal(k_img, (C, H, W), dtype=jnp.float32)
  w_img = jax.random.normal(k_w, (C, D), dtype=jnp.float32) * 0.2
  cam_text_feat = jax.random.normal(k_cam, (T, D), dtype=jnp.float32)
  sem_text_feat = jax.random.normal(k_sem, (T, D), dtype=jnp.float32)

  masks, conf = car_forward(image, w_img, cam_text_feat, sem_text_feat)
  masks, conf = jax.block_until_ready((masks, conf))

  assert masks.shape == (T, H, W), masks.shape
  assert conf.shape == (T,), conf.shape
  assert bool(jnp.all(jnp.isfinite(conf))), conf
  print("KERNEL_OK")
</pallas_src>

<mosaic_0001>
module attributes {stable_mosaic.version = 11 : i64} {
  func.func @proj_kernel(%arg0: i32, %arg1: memref<32x4xbf16, #tpu.memory_space<vmem>>, %arg2: memref<4x256xbf16, #tpu.memory_space<vmem>>, %arg3: memref<32x256xbf16, #tpu.memory_space<vmem>>) attributes {dimension_semantics = [#tpu.dimension_semantics<parallel>], iteration_bounds = array<i64: 1>, scalar_prefetch = 0 : i64, scratch_operands = 0 : i64, tpu.core_type = #tpu.core_type<tc>, window_params = [{pipeline_mode = #tpu.pipeline_mode<synchronous>, transform_indices = @transform_0, window_bounds = array<i64: 32, 4>}, {transform_indices = @transform_1, window_bounds = array<i64: 4, 256>}, {transform_indices = @transform_2, window_bounds = array<i64: 32, 256>}]} {
    %c0 = arith.constant 0 : index
    %c0_0 = arith.constant 0 : index
    %0 = vector.load %arg1[%c0, %c0_0] : memref<32x4xbf16, #tpu.memory_space<vmem>>, vector<32x4xbf16>
    %c0_1 = arith.constant 0 : index
    %c0_2 = arith.constant 0 : index
    %1 = vector.load %arg2[%c0_1, %c0_2] : memref<4x256xbf16, #tpu.memory_space<vmem>>, vector<4x256xbf16>
    %cst = arith.constant dense<0.000000e+00> : vector<32x256xf32>
    %2 = tpu.matmul %0, %1, %cst {dimension_numbers = #tpu.dot_dimension_numbers<[1], [0], [0], [1], [0, 0, 1, 1], [], []>} : vector<32x4xbf16>, vector<4x256xbf16>, vector<32x256xf32> -> vector<32x256xf32>
    %3 = arith.truncf %2 : vector<32x256xf32> to vector<32x256xbf16>
    %c0_3 = arith.constant 0 : index
    %c0_4 = arith.constant 0 : index
    %4 = vector.load %arg3[%c0_3, %c0_4] : memref<32x256xbf16, #tpu.memory_space<vmem>>, vector<32x256xbf16>
    tpu.vector_store %arg3[%c0_3, %c0_4], %3 {strides = array<i32>} : memref<32x256xbf16, #tpu.memory_space<vmem>>, vector<32x256xbf16>,
    return
  }
  func.func @transform_0(%arg0: i32) -> (i32, i32) {
    %c0_i32 = arith.constant 0 : i32
    %c0_i32_0 = arith.constant 0 : i32
    %c0_i32_1 = arith.constant 0 : i32
    return %c0_i32, %c0_i32_0 : i32, i32
  }
  func.func @transform_1(%arg0: i32) -> (i32, i32) {
    %c0_i32 = arith.constant 0 : i32
    %c0_i32_0 = arith.constant 0 : i32
    return %c0_i32, %arg0 : i32, i32
  }
  func.func @transform_2(%arg0: i32) -> (i32, i32) {
    %c0_i32 = arith.constant 0 : i32
    %c0_i32_0 = arith.constant 0 : i32
    return %c0_i32, %arg0 : i32, i32
  }
}

</mosaic_0001>

<bundles_post_ra>
// kernel: tpu_custom_call.1
= control target key start
LH: loop header
LB: loop body
LE: loop exit
PB: predicated region body
PF: predicated region fallthrough
CT: control target
= control target key end

     0   :  { %vm44_vm0 = vcmask 1041408   ;;  %v192_v3 = vmov 0   ;;  %s223_s0 = inlined_call_operand.vmem [shape: bf16[32,4], index: 0, kind: input, shape index: {}]   ;;  %s224_s1 = inlined_call_operand.vmem [shape: bf16[4,256], index: 1, kind: input, shape index: {}]   ;;  %s225_s2 = inlined_call_operand.hbm [shape: bf16[32,256], index: 2, kind: output, shape index: {}]  }
   0x1   :  { %v150_v0 = vld.sshfl [vmem:[%s224_s1] sm:$0x33 pattern:$0x76325410]  ;;  %83 = vmatprep.mubr.bf16.mxu0 %v192_v3  ;;  %93 = vmatprep.mubr.bf16.mxu1 %v192_v3  ;;  %v169_v5 = vld [vmem:[%s223_s0 + $0x8] sm:$0xff]  }
   0x2   :  { %v36_v1 = vcombine.high %v150_v0, %v150_v0  ;;  %v46_v2 = vsel %vm44_vm0, %v150_v0, 0  ;;  %v168_v4 = vld [vmem:[%s223_s0] sm:$0xff]  }
   0x4   :  { %151 = vmatprep.subr.msk.bf16.mxu0 %vm44_vm0, %v36_v1  ;;  %162 = vmatprep.subr.msk.bf16.mxu1 %vm44_vm0, %v36_v1 }
   0x5   :  { %7 = vsyncpa [#allocation3], 0  ;;  %66 = vmatpush1.bf16.msra.mxu0 %v46_v2  ;;  %163 = vmatpush1.bf16.msra.mxu1 %v46_v2  ;;  %vm37_vm1 = vcmask 31744   ;;  %s193_s1 = smov [#allocation2]  }
   0x6   :  { %s137_s15 = sshll.u32 %s193_s1, 4  ;;  %s138_s15 = int_to_ptr.vmem [resolvable:$true] %s137_s15 }
   0x7   :  { %s170_s0 = scalar_lea.vmem %s138_s15, 512  ;;  %p175_p1 = scmp.lt.s32.totalorder %s138_s15, %s138_s15 }
   0x8   :  { %152 = vmatmul.mubr.msk.bf16.vlgmr.msra.gmra.mxu0 %vm37_vm1, %v168_v4  ;;  %153 = vmatmul.mubr.msk.bf16.vlgmr.msra.gmra.mxu1 %vm37_vm1, %v169_v5  ;;  %p171_p0 = scmp.ne.s32.totalorder %s138_s15, %s170_s0  ;;  %p176_p2 = scmp.lt.s32.totalorder %s170_s0, %s170_s0 }
   0xa   :  { %p177_p3 = por %p176_p2, %p175_p1 }
   0xc   :  { %p178_p4 = pnand %p177_p3, %p171_p0 }
  0xc8   :  { %v85_v6 = vpop.f32.mrf.mxu0  ;;  %v95_v7 = vpop.f32.mrf.mxu1 }
  0xca   :  { %v87_v8 = vpop.f32.mrf.mxu0  ;;  %v97_v9 = vpop.f32.mrf.mxu1 }
  0xcb   :  { %v158_v10 = vpack.c.bf16 %v87_v8, %v85_v6  ;;  %v160_v11 = vpack.c.bf16 %v97_v9, %v95_v7 }
  0xcc   :  { %v89_v12 = vpop.f32.mrf.mxu0  ;;  %v99_v13 = vpop.f32.mrf.mxu1 }
  0xcd   :  { %128 = vst [vmem:[#allocation2] sm:$0xff] %v158_v10  ;;  %130 = vst [vmem:[#allocation2 + $0x10] sm:$0xff] %v160_v11 }
  0xce   :  { %v91_v14 = vpop.f32.mrf.mxu0  ;;  %v101_v15 = vpop.f32.mrf.mxu1 }
  0xcf   :  { %v159_v16 = vpack.c.bf16 %v91_v14, %v89_v12  ;;  %v161_v17 = vpack.c.bf16 %v101_v15, %v99_v13 }
  0xd1   :  { %129 = vst [vmem:[#allocation2 + $0x8] sm:$0xff] %v159_v16  ;;  %131 = vst [vmem:[#allocation2 + $0x18] sm:$0xff] %v161_v17 }
  0xd2   :  { %181 = shalt.err (!%p178_p4)
}
  0xd3   :  { %s194_s16 = smov 128   ;;  %s195_s17 = smov 8  }
  0xd4   :  { %143 = dma.vmem_to_hbm [thread:$0]  %s138_s15, 512, %s225_s2, [#allocation3], %s194_s16, %s194_s16, %s195_s17  }
  0xd5   :  { %190 = dma.done.wait [#allocation3], 512  }
  0xd6   :  { %191 = vsyncadd [#allocation3], 4294966784 }
  0xd7   :  { %147 = vsyncpa [#allocation3], 1 }

</bundles_post_ra>
